<compile_context>
chip_gen: v7x
topology: tpu7x:2x2x1
jax: 0.10.0
libtpu: 0.0.40
codegen_flags: <defaults>
</compile_context>

<pallas_src>
import math

import jax
import jax.numpy as jnp
from jax.experimental import pallas as pl
from jax.experimental.pallas import tpu as pltpu


_TARGET_CHUNK_BYTES = 8 << 20   # ~8 MiB per DMA: big enough to sit at HBM roofline
_MAX_CHUNKS = 16                # kernel is fully unrolled; keeps each DMA large


def _sublane_multiple(dtype):
    """Minimum sublane granularity per dtype (packed dtypes pack along sublanes)."""
    return max(8, 32 // jnp.dtype(dtype).itemsize)   # f32 -> 8, bf16 -> 16, int8/fp8 -> 32


def _choose_num_chunks(rows, row_bytes, sublane):
    """Pick a divisor of `rows` giving 2.._MAX_CHUNKS chunks, preferring
    sublane-aligned chunk rows and ~_TARGET_CHUNK_BYTES per chunk.
    >= 2 chunks keeps two DMAs in flight; 1 means a single whole-slab DMA."""
    total = rows * row_bytes
    desired = max(2, min(_MAX_CHUNKS,
                         (total + _TARGET_CHUNK_BYTES - 1) // _TARGET_CHUNK_BYTES))
    aligned, any_div = [], []
    for c in range(2, _MAX_CHUNKS + 1):
        if rows % c == 0:
            any_div.append(c)
            if (rows // c) % sublane == 0:
                aligned.append(c)
    for cands in (aligned, any_div):
        if cands:
            return min(cands, key=lambda c: abs(c - desired))
    return 1


def _make_dma_copy_kernel(n_chunks, chunk_rows):
    """HBM->HBM chunked identity copy, up to 2 DMAs in flight, no VMEM round-trip."""

    def kernel(x_hbm, o_hbm, sem):
        if n_chunks == 1:
            cp = pltpu.make_async_copy(x_hbm, o_hbm, sem.at[0])
            cp.start()
            cp.wait()
            return

        def chunk(i):
            sl = pl.ds(i * chunk_rows, chunk_rows)      # static start / size
            return pltpu.make_async_copy(x_hbm.at[sl], o_hbm.at[sl], sem.at[i % 2])

        # Prime two in-flight DMAs, then wait / refill. n_chunks <= _MAX_CHUNKS,
        # so full Python unrolling is cheap and keeps everything static.
        chunk(0).start()
        chunk(1).start()
        for i in range(n_chunks):
            chunk(i).wait()
            if i + 2 < n_chunks:
                chunk(i + 2).start()

    return kernel


def _materialize_copy(x):
    """Fresh-buffer identity copy of `x` via direct HBM->HBM DMA (no aliasing)."""
    n = x.size
    itemsize = jnp.dtype(x.dtype).itemsize

    if n % 128 == 0:
        # Flatten (batch included) to a lane-dense contiguous slab; row-major
        # reinterpretation, so element order matches torch .view exactly.
        rows, lanes = n // 128, 128
        slab = x.reshape(rows, lanes)                    # free metadata reshape
        n_chunks = _choose_num_chunks(rows, lanes * itemsize, _sublane_multiple(x.dtype))
        chunk_rows = rows // n_chunks
    else:
        # Ragged element count: single whole-array DMA on the original shape.
        slab = x
        n_chunks, chunk_rows = 1, x.shape[0]

    out = pl.pallas_call(
        _make_dma_copy_kernel(n_chunks, chunk_rows),
        out_shape=jax.ShapeDtypeStruct(slab.shape, slab.dtype),
        in_specs=[pl.BlockSpec(memory_space=pl.ANY)],    # raw HBM ref, no auto-DMA
        out_specs=pl.BlockSpec(memory_space=pl.ANY),
        scratch_shapes=[pltpu.SemaphoreType.DMA((2,))],
        cost_estimate=pl.CostEstimate(
            flops=0, transcendentals=0, bytes_accessed=2 * n * itemsize),
    )(slab)
    return out


def pallas_reshape(x, outer_shape, *, materialize=False, min_kernel_bytes=256 * 1024):
    """Equivalent of torch `x.view(x.size(0), *outer_shape)`.

    materialize=False (default): pure metadata reshape — zero HBM traffic,
    matching torch .view() cost.
    materialize=True: produce a fresh buffer via a chunked HBM->HBM DMA kernel
    (never donates / aliases the caller's array). Inputs smaller than
    `min_kernel_bytes` skip the kernel (launch overhead > copy cost).
    """
    assert x.ndim >= 1, "Reshape expects at least a batch dimension"
    b = x.shape[0]
    flat = int(math.prod(x.shape[1:])) if x.ndim > 1 else 1
    target = (b, *outer_shape)
    assert flat == int(math.prod(outer_shape)), (
        f"cannot view {x.shape} as ({b}, *{tuple(outer_shape)})"
    )

    if not materialize:
        # .view() is metadata-only; XLA reshape of contiguous data is a bitcast.
        return x.reshape(target)

    total_bytes = x.size * jnp.dtype(x.dtype).itemsize
    if total_bytes < min_kernel_bytes:
        # Kernel launch overhead dominates an HBM-trivial copy; the view is free.
        return x.reshape(target)

    return _materialize_copy(x).reshape(target)


if __name__ == "__main__":
    key = jax.random.PRNGKey(0)
    k1, k2 = jax.random.split(key)

    # Case 1: small NCHW conv-style input (what the GMVAE encoder produces).
    B, C, H, W = 2, 4, 16, 16
    x = jax.random.normal(k1, (B, C, H, W), dtype=jnp.float32)
    outer_shape = (16, 64)   # reinterpret the 4*16*16 = 1024 trailing elements

    # Default (production) path: pure metadata reshape, zero copies.
    y_meta = pallas_reshape(x, outer_shape)

    # Force the Pallas DMA-copy kernel even at this tiny size (min_kernel_bytes=0)
    # so the kernel path is exercised: (16, 128) slab, 2 chunks, 2 DMAs in flight.
    y = pallas_reshape(x, outer_shape, materialize=True, min_kernel_bytes=0)
    jax.block_until_ready(y)

    y_ref = x.reshape(B, *outer_shape)
    assert y.shape == (B, *outer_shape), y.shape
    assert y.dtype == x.dtype
    assert jnp.array_equal(y, y_ref), "Pallas reshape (materialize) mismatch"
    assert jnp.array_equal(y_meta, y_ref), "metadata reshape mismatch"

    # Case 2: bf16 input large enough (256 KiB) to take the kernel path with the
    # default threshold; exercises dtype-aware (16-sublane) chunking.
    x2 = jax.random.normal(k2, (4, 8, 32, 128), dtype=jnp.bfloat16)
    outer_shape2 = (32, 1024)
    y2 = pallas_reshape(x2, outer_shape2, materialize=True)
    jax.block_until_ready(y2)
    y2_ref = x2.reshape(4, *outer_shape2)
    assert y2.shape == (4, *outer_shape2) and y2.dtype == x2.dtype
    assert jnp.array_equal(y2, y2_ref), "Pallas reshape (bf16) mismatch"

    print("KERNEL_OK")
</pallas_src>

<mosaic_0001>
module attributes {stable_mosaic.version = 11 : i64} {
  func.func @kernel(%arg0: memref<16x128xf32, #tpu.memory_space<any>>, %arg1: memref<16x128xf32, #tpu.memory_space<any>>, %arg2: memref<2x!tpu.dma_semaphore, #tpu.memory_space<semaphore_mem>>) attributes {dimension_semantics = [], scalar_prefetch = 0 : i64, scratch_operands = 1 : i64, tpu.core_type = #tpu.core_type<tc>} {
    %c0_i32 = arith.constant 0 : i32
    %c0_i32_0 = arith.constant 0 : i32
    %c0_i32_1 = arith.constant 0 : i32
    %0 = tpu.memref_slice %arg0[%c0_i32_0, %c0_i32_1] : memref<16x128xf32, #tpu.memory_space<any>> -> memref<8x128xf32, #tpu.memory_space<any>>
    %c0_i32_2 = arith.constant 0 : i32
    %c0_i32_3 = arith.constant 0 : i32
    %1 = tpu.memref_slice %arg1[%c0_i32_2, %c0_i32_3] : memref<16x128xf32, #tpu.memory_space<any>> -> memref<8x128xf32, #tpu.memory_space<any>>
    %2 = tpu.memref_slice %arg2[%c0_i32] : memref<2x!tpu.dma_semaphore, #tpu.memory_space<semaphore_mem>> -> memref<1x!tpu.dma_semaphore, #tpu.memory_space<semaphore_mem>>
    %3 = tpu.memref_squeeze %2 : memref<1x!tpu.dma_semaphore, #tpu.memory_space<semaphore_mem>> -> memref<!tpu.dma_semaphore, #tpu.memory_space<semaphore_mem>>
    tpu.enqueue_dma source(%0 : memref<8x128xf32, #tpu.memory_space<any>>) target(%1 : memref<8x128xf32, #tpu.memory_space<any>>) target_semaphore(%3 : memref<!tpu.dma_semaphore, #tpu.memory_space<semaphore_mem>>)
    %c1_i32 = arith.constant 1 : i32
    %c8_i32 = arith.constant 8 : i32
    %c0_i32_4 = arith.constant 0 : i32
    %4 = tpu.memref_slice %arg0[%c8_i32, %c0_i32_4] : memref<16x128xf32, #tpu.memory_space<any>> -> memref<8x128xf32, #tpu.memory_space<any>>
    %c8_i32_5 = arith.constant 8 : i32
    %c0_i32_6 = arith.constant 0 : i32
    %5 = tpu.memref_slice %arg1[%c8_i32_5, %c0_i32_6] : memref<16x128xf32, #tpu.memory_space<any>> -> memref<8x128xf32, #tpu.memory_space<any>>
    %6 = tpu.memref_slice %arg2[%c1_i32] : memref<2x!tpu.dma_semaphore, #tpu.memory_space<semaphore_mem>> -> memref<1x!tpu.dma_semaphore, #tpu.memory_space<semaphore_mem>>
    %7 = tpu.memref_squeeze %6 : memref<1x!tpu.dma_semaphore, #tpu.memory_space<semaphore_mem>> -> memref<!tpu.dma_semaphore, #tpu.memory_space<semaphore_mem>>
    tpu.enqueue_dma source(%4 : memref<8x128xf32, #tpu.memory_space<any>>) target(%5 : memref<8x128xf32, #tpu.memory_space<any>>) target_semaphore(%7 : memref<!tpu.dma_semaphore, #tpu.memory_space<semaphore_mem>>)
    %c0_i32_7 = arith.constant 0 : i32
    %c0_i32_8 = arith.constant 0 : i32
    %c0_i32_9 = arith.constant 0 : i32
    %8 = tpu.memref_slice %arg0[%c0_i32_8, %c0_i32_9] : memref<16x128xf32, #tpu.memory_space<any>> -> memref<8x128xf32, #tpu.memory_space<any>>
    %c0_i32_10 = arith.constant 0 : i32
    %c0_i32_11 = arith.constant 0 : i32
    %9 = tpu.memref_slice %arg1[%c0_i32_10, %c0_i32_11] : memref<16x128xf32, #tpu.memory_space<any>> -> memref<8x128xf32, #tpu.memory_space<any>>
    %10 = tpu.memref_slice %arg2[%c0_i32_7] : memref<2x!tpu.dma_semaphore, #tpu.memory_space<semaphore_mem>> -> memref<1x!tpu.dma_semaphore, #tpu.memory_space<semaphore_mem>>
    %11 = tpu.memref_squeeze %10 : memref<1x!tpu.dma_semaphore, #tpu.memory_space<semaphore_mem>> -> memref<!tpu.dma_semaphore, #tpu.memory_space<semaphore_mem>>
    tpu.wait_dma2 semaphore(%11 : memref<!tpu.dma_semaphore, #tpu.memory_space<semaphore_mem>>) src(%8 : memref<8x128xf32, #tpu.memory_space<any>>) dst(%9 : memref<8x128xf32, #tpu.memory_space<any>>)
    %c1_i32_12 = arith.constant 1 : i32
    %c8_i32_13 = arith.constant 8 : i32
    %c0_i32_14 = arith.constant 0 : i32
    %12 = tpu.memref_slice %arg0[%c8_i32_13, %c0_i32_14] : memref<16x128xf32, #tpu.memory_space<any>> -> memref<8x128xf32, #tpu.memory_space<any>>
    %c8_i32_15 = arith.constant 8 : i32
    %c0_i32_16 = arith.constant 0 : i32
    %13 = tpu.memref_slice %arg1[%c8_i32_15, %c0_i32_16] : memref<16x128xf32, #tpu.memory_space<any>> -> memref<8x128xf32, #tpu.memory_space<any>>
    %14 = tpu.memref_slice %arg2[%c1_i32_12] : memref<2x!tpu.dma_semaphore, #tpu.memory_space<semaphore_mem>> -> memref<1x!tpu.dma_semaphore, #tpu.memory_space<semaphore_mem>>
    %15 = tpu.memref_squeeze %14 : memref<1x!tpu.dma_semaphore, #tpu.memory_space<semaphore_mem>> -> memref<!tpu.dma_semaphore, #tpu.memory_space<semaphore_mem>>
    tpu.wait_dma2 semaphore(%15 : memref<!tpu.dma_semaphore, #tpu.memory_space<semaphore_mem>>) src(%12 : memref<8x128xf32, #tpu.memory_space<any>>) dst(%13 : memref<8x128xf32, #tpu.memory_space<any>>)
    return
  }
}

</mosaic_0001>

<bundles_post_ra>
// kernel: tpu_custom_call.1
= control target key start
LH: loop header
LB: loop body
LE: loop exit
PB: predicated region body
PF: predicated region fallthrough
CT: control target
= control target key end

     0   :  { %s64_s9 = smov [#allocation2]   ;;  %s65_s10 = smov [#allocation3]   ;;  %s91_s0 = inlined_call_operand.hbm [shape: f32[16,128], index: 0, kind: input, shape index: {}]   ;;  %s92_s1 = inlined_call_operand.hbm [shape: f32[16,128], index: 1, kind: output, shape index: {}]  }
   0x1   :  { %s19_s8 = scalar_lea.hbm %s91_s0, 128  ;;  %s66_s11 = smov 0  }
   0x2   :  { %18 = dma.general %s91_s0, 128, %s92_s1, %s64_s9, %s65_s10, [#allocation4], %s66_s11, 0  }
   0x3   :  { %s20_s18 = scalar_lea.hbm %s92_s1, 128  ;;  %s67_s19 = smov [#allocation2 + $0x1]  }
   0x4   :  { %s68_s20 = smov [#allocation5]  }
   0x5   :  { %34 = dma.general %s19_s8, 128, %s20_s18, %s67_s19, %s68_s20, [#allocation6], %s66_s11, 0  }
   0x6   :  { %60 = dma.done.wait [#allocation2], 128 }
   0x7   :  { %61 = vsyncadd [#allocation2], 4294967168 }
   0x8   :  { %62 = dma.done.wait [#allocation2 + $0x1], 128 }
   0x9   :  { %63 = vsyncadd [#allocation2 + $0x1], 4294967168 }
   0xa   :  { %40 = vsyncmov [#allocation2] }
   0xd   :  { %s41_s21 = vpop.sfrf %40 }
   0xe   :  { %p53_p0 = scmp.ne.s32.totalorder %s41_s21, 0 }
  0x10   :  { %45 = shalt.err (%p53_p0)  }
  0x11   :  { %47 = vsyncmov [#allocation2 + $0x1] }
  0x14   :  { %s48_s22 = vpop.sfrf %47 }
  0x15   :  { %p54_p1 = scmp.ne.s32.totalorder %s48_s22, 0 }
  0x17   :  { %52 = shalt.err (%p54_p1)  }

</bundles_post_ra>
